<compile_context>
chip_gen: v7x
topology: tpu7x:2x2x1
jax: 0.10.0
libtpu: 0.0.40
codegen_flags: <defaults>
</compile_context>

<pallas_src>
import functools

import jax
import jax.numpy as jnp
from jax.experimental import pallas as pl
from jax.experimental.pallas import tpu as pltpu


def _mlp_kernel(xT_ref, w1_ref, b1_ref, wtail_ref, oT_ref):
    # Lane-dense layout: batch on lanes, features on sublanes.
    # Layer 1: (9, 10) @ (10, TBL) -> (9, TBL), add bias (9, 1), sigmoid (EUP).
    h = jnp.dot(w1_ref[...], xT_ref[...], preferred_element_type=jnp.float32)
    h = jax.nn.sigmoid(h + b1_ref[...])
    # Fused tail (W4 @ W3 @ W2): (6, 9) @ (9, TBL) -> (6, TBL).
    oT_ref[...] = jnp.dot(
        wtail_ref[...], h, preferred_element_type=jnp.float32
    ).astype(oT_ref.dtype)


def fuse_tail_weights(w2, w3, w4):
    """Fold the three bias-free linear layers into one (6, 9) weight (at init).

    Weights are in PyTorch layout (out, in); the fused layer computes
    W4 @ W3 @ W2 so that  y^T = W_tail @ h^T  matches  ((h@W2^T)@W3^T)@W4^T.
    """
    return w4 @ w3 @ w2


def _pick_tbl(batch, tbl):
    """Clamp the lane-tile: multiple of 128, <= padded batch, grid >= 4 if possible."""
    tbl = max(128, (int(tbl) // 128) * 128)
    b_up = ((batch + 127) // 128) * 128
    tbl = min(tbl, b_up)
    if batch >= 4 * 128:
        tbl = min(tbl, max(128, (batch // 4 // 128) * 128))
    return tbl


@functools.partial(jax.jit, static_argnames=("tbl",))
def _forward_pallas(x, w1, b1, wtail, *, tbl):
    """x: (B, 10) f32.  w1: (9, 10), b1: (9,), wtail: (6, 9)  (torch layout)."""
    B = x.shape[0]
    f_out, f_hid = wtail.shape          # (6, 9)
    f_in = w1.shape[1]                  # 10

    xT = x.T                            # (10, B): batch -> lanes
    b1c = b1.reshape(f_hid, 1)          # (9, 1): broadcasts over lanes

    grid = (pl.cdiv(B, tbl),)
    cost = pl.CostEstimate(
        flops=int(2 * B * (f_in * f_hid + f_hid * f_out)),
        transcendentals=int(B * f_hid),
        bytes_accessed=int(4 * B * (f_in + f_out)),
    )

    oT = pl.pallas_call(
        _mlp_kernel,
        out_shape=jax.ShapeDtypeStruct((f_out, B), jnp.float32),
        grid=grid,
        in_specs=[
            pl.BlockSpec((f_in, tbl), lambda i: (0, i)),     # x^T: tiled on lanes
            pl.BlockSpec((f_hid, f_in), lambda i: (0, 0)),   # W1: resident
            pl.BlockSpec((f_hid, 1), lambda i: (0, 0)),      # b1: resident
            pl.BlockSpec((f_out, f_hid), lambda i: (0, 0)),  # fused W4@W3@W2
        ],
        out_specs=pl.BlockSpec((f_out, tbl), lambda i: (0, i)),
        compiler_params=pltpu.CompilerParams(
            dimension_semantics=("parallel",),
        ),
        cost_estimate=cost,
    )(xT, w1, b1c, wtail)
    return oT.T                          # (B, 6)


def mymodel_forward(x, w1, b1, wtail, *, tbl=8192, small_batch_threshold=512):
    """Forward pass of MyModel.

    x: (B, 10) f32.  w1: (9, 10), b1: (9,), wtail: (6, 9) (= W4 @ W3 @ W2).
    Small batches take the plain-XLA path (pallas_call overhead dominates there).
    """
    B = x.shape[0]
    if B <= small_batch_threshold:
        return jax.nn.sigmoid(x @ w1.T + b1) @ wtail.T
    return _forward_pallas(x, w1, b1, wtail, tbl=_pick_tbl(B, tbl))


def _init_linear(key, fan_in, fan_out, bias):
    # Deterministic init mimicking torch.nn.Linear's uniform(+/- 1/sqrt(fan_in)).
    kw, kb = jax.random.split(key)
    bound = 1.0 / jnp.sqrt(jnp.float32(fan_in))
    # torch layout: (out, in); layer computes x @ W.T + b
    w = jax.random.uniform(kw, (fan_out, fan_in), jnp.float32, -bound, bound)
    b = (
        jax.random.uniform(kb, (fan_out,), jnp.float32, -bound, bound)
        if bias
        else None
    )
    return w, b


if __name__ == "__main__":
    key = jax.random.PRNGKey(0)
    k_x, k1, k2, k3, k4 = jax.random.split(key, 5)

    # Big enough to take the Pallas path with a 4-step parallel grid
    # (TBL=512 lanes per step); still tiny in absolute bytes.
    B = 2048
    x = jax.random.normal(k_x, (B, 10), jnp.float32)

    w1, b1 = _init_linear(k1, 10, 9, bias=True)
    w2, _ = _init_linear(k2, 9, 8, bias=False)
    w3, _ = _init_linear(k3, 8, 7, bias=False)
    w4, _ = _init_linear(k4, 7, 6, bias=False)

    # One-time (init-level) algebraic fusion of the three bias-free tail layers.
    wtail = fuse_tail_weights(w2, w3, w4)

    out = mymodel_forward(x, w1, b1, wtail)
    out = jax.block_until_ready(out)

    # Reference in plain JAX (un-fused, matching the PyTorch module exactly).
    ref = jax.nn.sigmoid(x @ w1.T + b1)
    ref = ((ref @ w2.T) @ w3.T) @ w4.T
    assert out.shape == (B, 6)
    assert jnp.allclose(out, ref, atol=1e-4, rtol=1e-4), (
        jnp.max(jnp.abs(out - ref))
    )

    print("KERNEL_OK")
</pallas_src>

<mosaic_0001>
module attributes {stable_mosaic.version = 11 : i64} {
  func.func @_mlp_kernel(%arg0: i32, %arg1: memref<10x512xf32, #tpu.memory_space<vmem>>, %arg2: memref<9x10xf32, #tpu.memory_space<vmem>>, %arg3: memref<9x1xf32, #tpu.memory_space<vmem>>, %arg4: memref<6x9xf32, #tpu.memory_space<vmem>>, %arg5: memref<6x512xf32, #tpu.memory_space<vmem>>) attributes {dimension_semantics = [#tpu.dimension_semantics<parallel>], iteration_bounds = array<i64: 4>, scalar_prefetch = 0 : i64, scratch_operands = 0 : i64, tpu.core_type = #tpu.core_type<tc>, window_params = [{transform_indices = @transform_0, window_bounds = array<i64: 10, 512>}, {pipeline_mode = #tpu.pipeline_mode<synchronous>, transform_indices = @transform_1, window_bounds = array<i64: 9, 10>}, {pipeline_mode = #tpu.pipeline_mode<synchronous>, transform_indices = @transform_2, window_bounds = array<i64: 9, 1>}, {pipeline_mode = #tpu.pipeline_mode<synchronous>, transform_indices = @transform_3, window_bounds = array<i64: 6, 9>}, {transform_indices = @transform_4, window_bounds = array<i64: 6, 512>}]} {
    %c0 = arith.constant 0 : index
    %c0_0 = arith.constant 0 : index
    %0 = vector.load %arg2[%c0, %c0_0] : memref<9x10xf32, #tpu.memory_space<vmem>>, vector<9x10xf32>
    %c0_1 = arith.constant 0 : index
    %c0_2 = arith.constant 0 : index
    %1 = vector.load %arg1[%c0_1, %c0_2] : memref<10x512xf32, #tpu.memory_space<vmem>>, vector<10x512xf32>
    %cst = arith.constant dense<0.000000e+00> : vector<9x512xf32>
    %2 = tpu.matmul %0, %1, %cst {dimension_numbers = #tpu.dot_dimension_numbers<[1], [0], [0], [1], [0, 0, 1, 1], [], []>} : vector<9x10xf32>, vector<10x512xf32>, vector<9x512xf32> -> vector<9x512xf32>
    %c0_3 = arith.constant 0 : index
    %c0_4 = arith.constant 0 : index
    %3 = vector.load %arg3[%c0_3, %c0_4] : memref<9x1xf32, #tpu.memory_space<vmem>>, vector<9x1xf32>
    %4 = vector.broadcast %3 : vector<9x1xf32> to vector<9x512xf32>
    %5 = arith.addf %2, %4 : vector<9x512xf32>
    %6 = arith.negf %5 : vector<9x512xf32>
    %7 = math.exp %6 : vector<9x512xf32>
    %cst_5 = arith.constant 1.000000e+00 : f32
    %8 = vector.broadcast %cst_5 : f32 to vector<9x512xf32>
    %9 = arith.addf %8, %7 : vector<9x512xf32>
    %10 = arith.divf %8, %9 : vector<9x512xf32>
    %c0_6 = arith.constant 0 : index
    %c0_7 = arith.constant 0 : index
    %11 = vector.load %arg4[%c0_6, %c0_7] : memref<6x9xf32, #tpu.memory_space<vmem>>, vector<6x9xf32>
    %cst_8 = arith.constant dense<0.000000e+00> : vector<6x512xf32>
    %12 = tpu.matmul %11, %10, %cst_8 {dimension_numbers = #tpu.dot_dimension_numbers<[1], [0], [0], [1], [0, 0, 1, 1], [], []>} : vector<6x9xf32>, vector<9x512xf32>, vector<6x512xf32> -> vector<6x512xf32>
    %c0_9 = arith.constant 0 : index
    %c0_10 = arith.constant 0 : index
    %13 = vector.load %arg5[%c0_9, %c0_10] : memref<6x512xf32, #tpu.memory_space<vmem>>, vector<6x512xf32>
    tpu.vector_store %arg5[%c0_9, %c0_10], %12 {strides = array<i32>} : memref<6x512xf32, #tpu.memory_space<vmem>>, vector<6x512xf32>,
    return
  }
  func.func @transform_0(%arg0: i32) -> (i32, i32) {
    %c0_i32 = arith.constant 0 : i32
    %c0_i32_0 = arith.constant 0 : i32
    return %c0_i32, %arg0 : i32, i32
  }
  func.func @transform_1(%arg0: i32) -> (i32, i32) {
    %c0_i32 = arith.constant 0 : i32
    %c0_i32_0 = arith.constant 0 : i32
    %c0_i32_1 = arith.constant 0 : i32
    return %c0_i32, %c0_i32_0 : i32, i32
  }
  func.func @transform_2(%arg0: i32) -> (i32, i32) {
    %c0_i32 = arith.constant 0 : i32
    %c0_i32_0 = arith.constant 0 : i32
    %c0_i32_1 = arith.constant 0 : i32
    return %c0_i32, %c0_i32_0 : i32, i32
  }
  func.func @transform_3(%arg0: i32) -> (i32, i32) {
    %c0_i32 = arith.constant 0 : i32
    %c0_i32_0 = arith.constant 0 : i32
    %c0_i32_1 = arith.constant 0 : i32
    return %c0_i32, %c0_i32_0 : i32, i32
  }
  func.func @transform_4(%arg0: i32) -> (i32, i32) {
    %c0_i32 = arith.constant 0 : i32
    %c0_i32_0 = arith.constant 0 : i32
    return %c0_i32, %arg0 : i32, i32
  }
}

</mosaic_0001>

<bundles_post_ra>
// kernel: _forward_pallas.1
= control target key start
LH: loop header
LB: loop body
LE: loop exit
PB: predicated region body
PF: predicated region fallthrough
CT: control target
= control target key end

     0   :  { %9 = vsyncpa [#allocation3], 0  ;;  %s1179_s0 = inlined_call_operand.hbm [shape: f32[10,2048], index: 0, kind: input, shape index: {}]   ;;  %s1180_s1 = inlined_call_operand.vmem [shape: f32[9,10], index: 1, kind: input, shape index: {}]   ;;  %s1181_s2 = inlined_call_operand.vmem [shape: f32[9,1], index: 2, kind: input, shape index: {}]   ;;  %s1182_s3 = inlined_call_operand.vmem [shape: f32[6,9], index: 3, kind: input, shape index: {}]   ;;  %s1183_s4 = inlined_call_operand.hbm [shape: f32[6,2048], index: 4, kind: output, shape index: {}]  }
   0x1   :  { %11 = vsyncpa [#allocation3 + $0x1], 0 }
   0x2   :  { %12 = vsyncpa [#allocation4], 0 }
   0x3   :  { %14 = vsyncpa [#allocation4 + $0x1], 0  ;;  %s989_s15 = smov 0   ;;  %s991_s16 = smov 0  }
   0x4   :  { %s993_s17 = smov 0   ;;  %s995_s18 = smov 0  }
   0x5 LB: > { %s1010_s19 = sadd.s32 4294967295, %s954_s18   ;;  %s711_s20 = sadd.s32 4294967294, %s954_s18   ;;  %s954_s18 = sphi %s995_s18, %s1198_s18   ;;  %s950_s17 = sphi %s993_s17, %s1197_s17   ;;  %s946_s16 = sphi %s991_s16, %s1196_s16   ;;  %s942_s15 = sphi %s989_s15, %s1195_s15  }
   0x6   : > { %s1014_s21 = sadd.s32 1, %s954_s18   ;;  %s27_s22 = sadd.s32 1, %s950_s17 }
   0x7   : > { %s24_s23 = ssub.s32 %s954_s18, %s1014_s21  ;;  %p34_p0 = scmp.ne.s32.totalorder %s950_s17, %s946_s16 }
   0x8   : > { %p25_p1 = scmp.eq.s32.totalorder %s24_s23, 0  ;;  %p35_p2 = scmp.eq.s32.totalorder %s954_s18, 0 }
   0x9   : > { %p40_p3 = scmp.ne.s32.totalorder %s946_s16, %s942_s15  ;;  %p41_p4 = scmp.eq.s32.totalorder %s1010_s19, 0 }
   0xa   : > { %s1026_s24 = scalar_select %p25_p1, %s950_s17, %s27_s22  }
   0xb   : > { %p1028_p5 = por %p35_p2, %p34_p0  ;;  %p1032_p6 = por %p41_p4, %p40_p3 }
   0xc   : > { %p127_p7 = scmp.eq.s32.totalorder %s1010_s19, 3  ;;  %p133_p8 = scmp.eq.s32.totalorder %s711_s20, 3 }
   0xd   : > { %p785_p9 = scmp.lt.s32.totalorder %s954_s18, 4  ;;  %s162_s29 = sand.u32 1, %s950_s17  }
   0xe   : > { %p1038_p10 = por %p127_p7, %p34_p0  ;;  %p1042_p11 = por %p133_p8, %p40_p3 }
   0xf   : > { %s747_s30 = sshll.u32 %s954_s18, 9  ;;  %s714_s5 = sshll.u32 %s162_s29, 6 }
  0x10   : > { %s1187_s27 = scalar_select %p1038_p10, 1, 0 }
  0x11   : > { %s1188_s28 = scalar_select %p1042_p11, 1, 0 }
  0x12   : > { %s1051_s8 = scalar_lea.hbm %s1179_s0, %s747_s30  ;;  %s166_s9 = scalar_lea.vmem [#allocation2], %s714_s5 }
  0x13   : > { %s173_s10 = sshll.u32 %s166_s9, 4  ;;  %p1055_p12 = pnand %p785_p9, %p1028_p5  ;;  %s1059_s10 = int_to_ptr.vmem [resolvable:$true] %s173_s10 }
  0x14   : > { %s1062_s12 = scalar_lea.sflag [#allocation3], %s162_s29  ;;  %s858_s13 = scalar_lea.hbm %s1051_s8, 1024 }
  0x15   : > { %p859_p0 = scmp.ne.s32.totalorder %s1051_s8, %s858_s13  ;;  %p860_p1 = pneg %p1055_p12 }
  0x16   : > { %s863_s22 = scalar_lea.hbm %s1179_s0, 4096  ;;  %p864_p4 = scmp.lt.u32.totalorder %s1051_s8, %s1179_s0 }
  0x17   : > { %p861_p2 = pnand %p860_p1, %p859_p0  ;;  %p865_p5 = scmp.lt.u32.totalorder %s863_s22, %s858_s13 }
  0x18   : > { %p867_p8 = scmp.lt.u32.totalorder %s858_s13, %s1051_s8 }
  0x19   : > { %p862_p3 = pneg %p861_p2  ;;  %p866_p7 = por %p865_p5, %p864_p4 }
  0x1b   : > { %p868_p9 = por %p867_p8, %p866_p7 }
  0x1d   : > { %p869_p13 = pnand %p868_p9, %p862_p3 }
  0x1f   : > { %872 = shalt.err (!%p869_p13)
}
  0x20   : > { %s873_s29 = scalar_lea.vmem %s1059_s10, 1024  ;;  %s956_s30 = smov [#allocation2]  }
  0x21   : > { %p874_p0 = scmp.ne.s32.totalorder %s1059_s10, %s873_s29  ;;  %s878_s5 = sshll.u32 %s956_s30, 4  ;;  %s879_s5 = int_to_ptr.vmem [resolvable:$false] %s878_s5 }
  0x22   : > { %s880_s6 = scalar_lea.vmem %s879_s5, 2048  ;;  %p881_p10 = scmp.lt.s32.totalorder %s1059_s10, %s879_s5 }
  0x23   : > { %p876_p2 = pnand %p874_p0, %p860_p1  ;;  %p882_p4 = scmp.lt.s32.totalorder %s880_s6, %s873_s29 }
  0x25   : > { %p877_p11 = pneg %p876_p2  ;;  %p883_p5 = por %p882_p4, %p881_p10 }
  0x27   : > { %p884_p7 = pnand %p883_p5, %p877_p11 }
  0x29   : > { %887 = shalt.err (!%p884_p7)
}
  0x2a   : > { %s957_s7 = smov 2048   ;;  %s958_s9 = smov 512  }
  0x2b   : > { %s959_s13 = smov 32   ;;  %p181_p13 = scmp.lt.s32.totalorder %s954_s18, 5 }
  0x2c   : > { %780 = dma.hbm_to_vmem [thread:$0]  (!%p1055_p12), %s1051_s8, 1024, %s1059_s10, %s1062_s12, %s957_s7, %s958_s9, %s959_s13  }
  0x2d   : > { %p1190_p1 = scmp.ge.s32.totalorder %s954_s18, 1 }
  0x2f   : > { %p182_p3 = pnand %p1190_p1, %p181_p13 }
  0x30   : > { %s1094_s14 = sand.u32 (!%p182_p3), 1, %s946_s16  }
  0x31   : > { %185 = sbr.rel (%p182_p3) target bundleno = 546 (0x222), region = 36  ;;  %s718_s20 = sshll.u32 (!%p182_p3), %s1094_s14, 6 }
  0x32   : > { %s188_s22 = scalar_lea.sflag (!%p182_p3), [#allocation3], %s1094_s14  ;;  %s191_s23 = scalar_lea.vmem (!%p182_p3), [#allocation2], %s718_s20 }
  0x38   : > { %933 = dma.done.wait (%p1032_p6), %s188_s22, 1024  }
  0x39   : > { %935 = vsyncadd (%p1032_p6), %s188_s22, 4294966272  ;;  %v960_v0 = vmov 0.0   ;;  %v961_v1 = vmov 0   ;;  %vm247_vm0 = vcmask 1041408   ;;  %vm962_vm1 = vmmov 1   ;;  %v221_v3 = vld [vmem:[%s191_s23 + $0x8] sm:$0xff] }
  0x3a   : > { %324 = vmatprep.mubr.f32.mxu0 %v960_v0  ;;  %401 = vmatprep.mubr.f32.mxu1 %v960_v0  ;;  %vm1103_vm2 = vmpackc.low %vm247_vm0, %vm962_vm1  ;;  %v225_v4 = vld [vmem:[%s191_s23 + $0x28] sm:$0x3]  ;;  %v223_v5 = vld [vmem:[%s191_s23 + $0x18] sm:$0xff]  ;;  %vm240_vm3 = vcmask 80896   ;;  %vm467_vm4 = vcmask 1040384   ;;  %vm463_vm6 = vcmask 72704  }
  0x3b   : > { %825 = vset.pattern.permute.xlu0 %v961_v1  ;;  %v749_v6 = vpack.c.bf16 %v225_v4, %v221_v3  ;;  %v227_v7 = vld [vmem:[%s191_s23 + $0x38] sm:$0x3]  ;;  %v220_v8 = vld [vmem:[%s191_s23] sm:$0xff]  ;;  %v222_v12 = vld [vmem:[%s191_s23 + $0x10] sm:$0xff]  ;;  %s719_s7 = sshll.u32 %s1094_s14, 5  ;;  %s748_s20 = sshll.u32 %s1010_s19, 9 }
  0x3c   : > { %v224_v9 = vld [vmem:[%s191_s23 + $0x20] sm:$0x3]  ;;  %v755_v10 = vpack.c.bf16 %v227_v7, %v223_v5  ;;  %v226_v13 = vld [vmem:[%s191_s23 + $0x30] sm:$0x3]  ;;  %v229_v17 = vld [vmem:[%s1181_s2 + $0x8] sm:$0x1]  ;;  %s1138_s26 = scalar_lea.hbm %s1183_s4, %s748_s20 }
  0x3d   : > { %v752_v11 = vpack.c.bf16 %v224_v9, %v220_v8  ;;  %751 = vmatprep.subr.msk.bf16.mxu0 %vm1103_vm2, %v749_v6  ;;  %v758_v14 = vpack.c.bf16 %v226_v13, %v222_v12  ;;  %v228_v15 = vld [vmem:[%s1181_s2] sm:$0xff]  ;;  %v219_v18 = vld [vmem:[%s1180_s1 + $0x8] sm:$0x1]  ;;  %vm762_vm5 = vmpackc.low %vm467_vm4, %vm962_vm1  ;;  %s215_s9 = scalar_lea.vmem [#allocation5], %s719_s7  ;;  %s627_s8 = scalar_lea.sflag [#allocation4], %s1094_s14 }
  0x3e   : > { %757 = vmatprep.subr.msk.bf16.mxu1 %vm1103_vm2, %v755_v10  ;;  %v218_v16 = vld [vmem:[%s1180_s1] sm:$0xff]  ;;  %232 = vperm.xlu0 %825, %v228_v15   ;;  %s641_s13 = sshll.u32 %s215_s9, 4  ;;  %p1193_p10 = scmp.ne.s32.totalorder %s1187_s27, 0  ;;  %s1133_s13 = int_to_ptr.vmem [resolvable:$true] %s641_s13 }
  0x3f   : > { %754 = vmatpush1.bf16.msk.msra.mxu0 %vm1103_vm2, %v752_v11  ;;  %760 = vmatpush1.bf16.msk.msra.mxu1 %vm1103_vm2, %v758_v14  ;;  %v462_v9 = vld [vmem:[%s1182_s3] sm:$0x3f]  ;;  %s888_s19 = scalar_lea.vmem %s1133_s13, 512  ;;  %s963_s10 = smov [#allocation5]  }
  0x40   : > { %p889_p6 = scmp.ne.s32.totalorder %s1133_s13, %s888_s19  ;;  %s892_s11 = sshll.u32 %s963_s10, 4  ;;  %s893_s11 = int_to_ptr.vmem [resolvable:$false] %s892_s11 }
  0x41   : > { %s894_s12 = scalar_lea.vmem %s893_s11, 1024  ;;  %p895_p8 = scmp.lt.s32.totalorder %s1133_s13, %s893_s11 }
  0x42   : > { %722 = vmatmul.mubr.msk.f32.vlgmr.msra.gmra.mrb[0].mxu0 %vm240_vm3, %v218_v16  ;;  %726 = vmatmul.mubr.msk.f32.vlgmr.msra.gmra.mrb[0].mxu1 %vm240_vm3, %v218_v16  ;;  %p890_p11 = pnand %p889_p6, %p1193_p10  ;;  %p896_p9 = scmp.lt.s32.totalorder %s894_s12, %s888_s19 }
  0x43   : > { %330 = vmatprep.mubr.f32.mxu0 %v960_v0  ;;  %407 = vmatprep.mubr.f32.mxu1 %v960_v0 }
  0x44   : > { %237 = vperm.xlu0 %825, %v229_v17   ;;  %p891_p12 = pneg %p890_p11  ;;  %p897_p0 = por %p896_p9, %p895_p8 }
  0x46   : > { %723 = vmatmul.mubr.msk.f32.gmra.mrb[2].mxu0 %vm240_vm3, %v219_v18  ;;  %727 = vmatmul.mubr.msk.f32.gmra.mrb[2].mxu1 %vm240_vm3, %v219_v18  ;;  %p898_p2 = pnand %p897_p0, %p891_p12 }
  0x47   : > { %544 = vmatprep.mubr.f32.mxu0 %v960_v0  ;;  %615 = vmatprep.mubr.f32.mxu1 %v960_v0 }
  0xbd   : > { %v233_v19 = vpop.permute.xlu0 %232 }
  0xc3   : > { %v238_v30 = vpop.permute.xlu0 %237 }
 0x115   : > { %v326_v20 = vpop.f32.mrb[0].mxu0  ;;  %v403_v22 = vpop.f32.mrb[0].mxu1 }
 0x116   : > { %v327_v21 = vadd.f32 %v326_v20, %v233_v19  ;;  %v328_v23 = vpop.f32.mrb[1].mxu0  ;;  %v404_v24 = vadd.f32 %v403_v22, %v233_v19  ;;  %v405_v26 = vpop.f32.mrb[1].mxu1 }
 0x117   : > { %v329_v25 = vadd.f32 %v328_v23, %v233_v19  ;;  %v406_v28 = vadd.f32 %v405_v26, %v233_v19 }
 0x118   : > { %v728_v27 = vmul.f32 -1.442695, %v327_v21  ;;  %v730_v29 = vmul.f32 -1.442695, %v404_v24 }
 0x119   : > { %v729_v31 = vmul.f32 -1.442695, %v329_v25  ;;  %v332_v32 = vpop.f32.mrb[2].mxu0  ;;  %v731_v33 = vmul.f32 -1.442695, %v406_v28  ;;  %v409_v35 = vpop.f32.mrb[2].mxu1 }
 0x11a   : > { %826 = vpow2.f32 %v728_v27  ;;  %v333_v34 = vadd.f32 %v332_v32, %v238_v30  ;;  %v334_v36 = vpop.f32.mrb[3].mxu0  ;;  %v410_v37 = vadd.f32 %v409_v35, %v238_v30  ;;  %v411_v39 = vpop.f32.mrb[3].mxu1 }
 0x11b   : > { %828 = vpow2.f32 %v730_v29  ;;  %v335_v38 = vadd.f32 %v334_v36, %v238_v30  ;;  %v412_v41 = vadd.f32 %v411_v39, %v238_v30 }
 0x11c   : > { %830 = vpow2.f32 %v729_v31  ;;  %v732_v40 = vmul.f32 -1.442695, %v333_v34  ;;  %v734_v42 = vmul.f32 -1.442695, %v410_v37 }
 0x11d   : > { %832 = vpow2.f32 %v731_v33  ;;  %v733_v43 = vmul.f32 -1.442695, %v335_v38  ;;  %v735_v44 = vmul.f32 -1.442695, %v412_v41 }
 0x11e   : > { %834 = vpow2.f32 %v732_v40 }
 0x11f   : > { %836 = vpow2.f32 %v734_v42 }
 0x120   : > { %838 = vpow2.f32 %v733_v43 }
 0x121   : > { %840 = vpow2.f32 %v735_v44 }
 0x124   : > { %v827_v45 = vpop.eup %826 }
 0x125   : > { %v829_v46 = vpop.eup %828  ;;  %v438_v47 = vadd.f32 1.0, %v827_v45 }
 0x126   : > { %v831_v48 = vpop.eup %830  ;;  %v440_v49 = vadd.f32 1.0, %v829_v46 }
 0x127   : > { %v833_v50 = vpop.eup %832  ;;  %842 = vrcp.f32 %v438_v47  ;;  %v439_v51 = vadd.f32 1.0, %v831_v48 }
 0x128   : > { %v835_v52 = vpop.eup %834  ;;  %844 = vrcp.f32 %v440_v49  ;;  %v441_v53 = vadd.f32 1.0, %v833_v50 }
 0x129   : > { %v837_v54 = vpop.eup %836  ;;  %846 = vrcp.f32 %v439_v51  ;;  %v442_v55 = vadd.f32 1.0, %v835_v52 }
 0x12a   : > { %v839_v56 = vpop.eup %838  ;;  %848 = vrcp.f32 %v441_v53  ;;  %v444_v57 = vadd.f32 1.0, %v837_v54 }
 0x12b   : > { %v841_v58 = vpop.eup %840  ;;  %850 = vrcp.f32 %v442_v55  ;;  %v443_v59 = vadd.f32 1.0, %v839_v56 }
 0x12c   : > { %852 = vrcp.f32 %v444_v57  ;;  %v445_v60 = vadd.f32 1.0, %v841_v58 }
 0x12d   : > { %854 = vrcp.f32 %v443_v59 }
 0x12e   : > { %856 = vrcp.f32 %v445_v60 }
 0x131   : > { %v843_v61 = vpop.eup %842 }
 0x132   : > { %v845_v62 = vpop.eup %844 }
 0x133   : > { %v847_v63 = vpop.eup %846 }
 0x134   : > { %v849_v0 = vpop.eup %848 }
 0x135   : > { %v851_v1 = vpop.eup %850 }
 0x136   : > { %v853_v2 = vpop.eup %852  ;;  %v764_v3 = vpack.c.bf16 %v851_v1, %v843_v61 }
 0x137   : > { %v855_v4 = vpop.eup %854  ;;  %v770_v5 = vpack.c.bf16 %v853_v2, %v845_v62 }
 0x138   : > { %v857_v6 = vpop.eup %856  ;;  %v761_v7 = vpack.c.bf16 %v855_v4, %v847_v63 }
 0x139   : > { %v767_v8 = vpack.c.bf16 %v857_v6, %v849_v0 }
 0x13a   : > { %763 = vmatprep.subr.msk.bf16.mxu0 %vm762_vm5, %v761_v7 }
 0x13b   : > { %769 = vmatprep.subr.msk.bf16.mxu1 %vm762_vm5, %v767_v8  ;;  %766 = vmatpush1.bf16.msk.msra.mxu0 %vm762_vm5, %v764_v3 }
 0x13c   : > { %772 = vmatpush1.bf16.msk.msra.mxu1 %vm762_vm5, %v770_v5 }
 0x13e   : > { %738 = vmatmul.mubr.msk.f32.vlgmr.msra.gmra.mrb[4].mxu0 %vm463_vm6, %v462_v9 }
 0x13f   : > { %741 = vmatmul.mubr.msk.f32.vlgmr.msra.gmra.mrb[4].mxu1 %vm463_vm6, %v462_v9 }
 0x211   : > { %v546_v10 = vpop.f32.mrb[4].mxu0 }
 0x212   : > { %622 = vst [vmem:[%s215_s9] sm:$0x3f] %v546_v10  ;;  %v617_v11 = vpop.f32.mrb[4].mxu1  ;;  %v548_v12 = vpop.f32.mrb[5].mxu0 }
 0x213   : > { %624 = vst [vmem:[%s215_s9 + $0x10] sm:$0x3f] %v617_v11  ;;  %623 = vst [vmem:[%s215_s9 + $0x8] sm:$0x3f] %v548_v12  ;;  %v619_v13 = vpop.f32.mrb[5].mxu1 }
 0x214   : > { %625 = vst [vmem:[%s215_s9 + $0x18] sm:$0x3f] %v619_v13 }
 0x215   : > { %901 = shalt.err (!%p898_p2)
}
 0x216   : > { %s902_s14 = scalar_lea.hbm %s1138_s26, 512  ;;  %s906_s30 = scalar_lea.hbm %s1183_s4, 2048 }
 0x217   : > { %p903_p4 = scmp.ne.s32.totalorder %s1138_s26, %s902_s14  ;;  %p907_p13 = scmp.lt.u32.totalorder %s1138_s26, %s1183_s4 }
 0x218   : > { %p908_p1 = scmp.lt.u32.totalorder %s906_s30, %s902_s14  ;;  %p910_p6 = scmp.lt.u32.totalorder %s902_s14, %s1138_s26 }
 0x219   : > { %p904_p5 = pnand %p903_p4, %p1193_p10 }
 0x21a   : > { %p909_p3 = por %p908_p1, %p907_p13 }
 0x21b   : > { %p905_p7 = pneg %p904_p5 }
 0x21c   : > { %p911_p11 = por %p910_p6, %p909_p3 }
 0x21e   : > { %p912_p12 = pnand %p911_p11, %p905_p7 }
 0x220   : > { %915 = shalt.err (!%p912_p12)
}
 0x221   : > { %775 = dma.vmem_to_hbm [thread:$0]  (%p1193_p10), %s1133_s13, 512, %s1138_s26, %s627_s8  }
 0x222 PF: > { %p786_p8 = scmp.ge.s32.totalorder %s954_s18, 2  ;;  %s653_s7 = sand.u32 1, %s942_s15  }
 0x223   : > { %p1194_p9 = scmp.ne.s32.totalorder %s1188_s28, 0  ;;  %s654_s9 = scalar_lea.sflag [#allocation4], %s653_s7 }
 0x225   : > { %p782_p0 = pnand %p786_p8, %p1194_p9 }
 0x227   : > { %937 = dma.done.wait (!%p782_p0), %s654_s9, 512  }
 0x228   : > { %939 = vsyncadd (!%p782_p0), %s654_s9, 4294966784  ;;  %p17_p2 = scmp.ge.s32.totalorder %s1014_s21, 6   ;;  %s1195_s15 = smov %s946_s16 }
 0x229   : > { %s1196_s16 = smov %s950_s17  ;;  %s1197_s17 = smov %s1026_s24 }
 0x22a   : > { %s1198_s18 = smov %s1014_s21  ;;  %19 = sbr.rel (!%p17_p2) target bundleno = 5 (0x5), region = 81 }
 0x231   :  { %659 = vsyncpa [#allocation3], 1 }
 0x232   :  { %661 = vsyncpa [#allocation3 + $0x1], 1 }
 0x233   :  { %662 = vsyncpa [#allocation4], 1 }
 0x234   :  { %664 = vsyncpa [#allocation4 + $0x1], 1 }

</bundles_post_ra>
